<compile_context>
chip_gen: v5e
topology: v5e:2x2
jax: 0.10.0
libtpu: 0.0.40
codegen_flags: <defaults>
</compile_context>

<pallas_src>
import math

import jax
import jax.numpy as jnp
from jax.experimental import pallas as pl
from jax.experimental.pallas import tpu as pltpu

EPS = 1e-5  # BatchNorm eps (PyTorch default)


def _round_up(v, m):
    return (v + m - 1) // m * m


# ---------------------------------------------------------------------------
# Fused kernel (NCHW native, per (batch, spatial-tile) grid step):
#   y = W2t @ relu(W1t @ x + b1) + b2
# W1t already contains the folded eval-mode BatchNorm scale and b1 the folded
# conv1 bias + BN shift; b2 is the conv2 bias.
# ---------------------------------------------------------------------------
def _cc_kernel(x_ref, w1t_ref, b1_ref, w2t_ref, b2_ref, o_ref):
    # x_ref: (1, Cin, thw) f32 -> cast to bf16 in-kernel (single HBM read of x).
    x = x_ref[0].astype(jnp.bfloat16)                               # (Cin, thw)
    # First 1x1 conv (+ folded BN scale): bf16 MXU, f32 accumulation.
    h = jnp.dot(w1t_ref[...], x, preferred_element_type=jnp.float32)  # (mid, thw)
    # Folded bias/BN shift + ReLU ((mid,1) broadcast along lanes).
    h = jnp.maximum(h + b1_ref[...], 0.0)
    # Second 1x1 conv, bf16 MXU, f32 accumulation, + conv2 bias.
    y = jnp.dot(w2t_ref[...], h.astype(jnp.bfloat16),
                preferred_element_type=jnp.float32)                 # (out_ch, thw)
    o_ref[0] = (y + b2_ref[...]).astype(o_ref.dtype)


def _choose_spatial_tile(hw, cap=1024):
    """Lane-axis (spatial) tile.  Returns (tile, padded_hw).

    * hw <= cap: one full-extent tile (always legal, zero padding).
    * else: largest multiple of 128 <= cap that divides hw exactly (no padding,
      big enough to amortize the ~0.35 us per-step overhead).
    * rare fallback: 512-wide tile with minimal padding.
    """
    if hw <= cap:
        return hw, hw
    for t in range(cap, 127, -128):
        if hw % t == 0:
            return t, hw
    t = 512
    return t, _round_up(hw, t)


def channel_compactor_forward(params, x_nchw):
    """ChannelCompactor forward. x: (B, in_ch, H, W) f32 -> (B, out_ch, H, W) f32."""
    w1t = params["w1t_bf16"]   # (mid, in_ch)   bf16, BN scale folded in
    b1 = params["b1"]          # (mid, 1)       f32, conv1 bias + BN shift folded
    w2t = params["w2t_bf16"]   # (out_ch, mid)  bf16
    b2 = params["b2"]          # (out_ch, 1)    f32, conv2 bias

    B, Cin, H, W = x_nchw.shape
    mid, in_ch = w1t.shape
    out_ch = w2t.shape[0]
    assert Cin == in_ch

    HW = H * W
    x3 = x_nchw.reshape(B, Cin, HW)          # free view: NCHW kept, no transpose

    thw, HWp = _choose_spatial_tile(HW)
    if HWp != HW:                            # rare fallback only
        x3 = jnp.pad(x3, ((0, 0), (0, 0), (0, HWp - HW)))
    n_s = HWp // thw

    out = pl.pallas_call(
        _cc_kernel,
        out_shape=jax.ShapeDtypeStruct((B, out_ch, HWp), jnp.float32),
        grid_spec=pltpu.PrefetchScalarGridSpec(
            num_scalar_prefetch=0,
            grid=(B, n_s),
            in_specs=[
                pl.BlockSpec((1, Cin, thw), lambda b, s: (b, 0, s)),   # x slab
                pl.BlockSpec((mid, in_ch), lambda b, s: (0, 0)),       # W1t (resident)
                pl.BlockSpec((mid, 1), lambda b, s: (0, 0)),           # b1  (resident)
                pl.BlockSpec((out_ch, mid), lambda b, s: (0, 0)),      # W2t (resident)
                pl.BlockSpec((out_ch, 1), lambda b, s: (0, 0)),        # b2  (resident)
            ],
            out_specs=pl.BlockSpec((1, out_ch, thw), lambda b, s: (b, 0, s)),
        ),
        compiler_params=pltpu.CompilerParams(
            dimension_semantics=("parallel", "parallel")),
    )(x3, w1t, b1, w2t, b2)

    if HWp != HW:
        out = out[:, :, :HW]
    return out.reshape(B, out_ch, H, W)      # free view: already NCHW


# ---------------------------------------------------------------------------
# Parameter construction: PyTorch-style init; conv1 bias + eval-mode BatchNorm
# folded into (W1t, b1) and weights pre-cast to bf16 ONCE at init time, so the
# jitted forward does no per-call folding / casting / reshaping of weights.
# ---------------------------------------------------------------------------
def init_channel_compactor(key, in_ch, out_ch, reduction=4):
    mid = out_ch // reduction
    ks = jax.random.split(key, 8)

    # nn.Conv2d default init: U(-b, b) with b = 1/sqrt(fan_in) (1x1 kernel).
    bnd1 = 1.0 / math.sqrt(in_ch)
    w1 = jax.random.uniform(ks[0], (mid, in_ch), jnp.float32, -bnd1, bnd1)   # (out, in)
    bias1 = jax.random.uniform(ks[1], (mid,), jnp.float32, -bnd1, bnd1)
    bnd2 = 1.0 / math.sqrt(mid)
    w2 = jax.random.uniform(ks[2], (out_ch, mid), jnp.float32, -bnd2, bnd2)
    bias2 = jax.random.uniform(ks[3], (out_ch,), jnp.float32, -bnd2, bnd2)

    # Eval-mode BatchNorm2d(mid) parameters (non-trivial values so that the
    # BN folding path is actually exercised; defaults would be gamma=1 etc.).
    gamma = jax.random.uniform(ks[4], (mid,), jnp.float32, 0.8, 1.2)
    beta = 0.1 * jax.random.normal(ks[5], (mid,), jnp.float32)
    r_mean = 0.1 * jax.random.normal(ks[6], (mid,), jnp.float32)
    r_var = jax.random.uniform(ks[7], (mid,), jnp.float32, 0.8, 1.2)

    # Fold conv1 bias + BN:  BN(W1 x + b1) = (scale*W1) x + (scale*(b1-mean)+beta)
    scale = gamma / jnp.sqrt(r_var + EPS)
    shift1 = scale * (bias1 - r_mean) + beta

    return {
        # kernel params (folded + pre-cast once, outside the jitted forward)
        "w1t_bf16": (scale[:, None] * w1).astype(jnp.bfloat16),   # (mid, in_ch)
        "b1": shift1[:, None],                                    # (mid, 1) f32
        "w2t_bf16": w2.astype(jnp.bfloat16),                      # (out_ch, mid)
        "b2": bias2[:, None],                                     # (out_ch, 1) f32
        # f32 originals for the reference check
        "w1_f32": w1, "bias1": bias1, "w2_f32": w2, "bias2": bias2,
        "bn": (gamma, beta, r_mean, r_var),
    }


def channel_compactor_reference(params, x_nchw):
    """Pure-JAX f32 reference of the PyTorch module (eval-mode BN), NCHW."""
    gamma, beta, mean, var = params["bn"]
    w1, b1 = params["w1_f32"], params["bias1"]
    w2, b2 = params["w2_f32"], params["bias2"]
    h = jnp.einsum("oc,bchw->bohw", w1, x_nchw) + b1[None, :, None, None]
    h = (h - mean[None, :, None, None]) / jnp.sqrt(var[None, :, None, None] + EPS)
    h = h * gamma[None, :, None, None] + beta[None, :, None, None]
    h = jnp.maximum(h, 0.0)
    return jnp.einsum("oc,bchw->bohw", w2, h) + b2[None, :, None, None]


# ---------------------------------------------------------------------------
if __name__ == "__main__":
    B, in_ch, H, W = 2, 192, 16, 16
    out_ch, reduction = 128, 4

    key = jax.random.PRNGKey(0)
    kp, kx = jax.random.split(key)
    params = init_channel_compactor(kp, in_ch, out_ch, reduction)
    x = jax.random.uniform(kx, (B, in_ch, H, W), jnp.float32)

    fwd = jax.jit(channel_compactor_forward)
    out = fwd(params, x)
    jax.block_until_ready(out)

    assert out.shape == (B, out_ch, H, W)

    ref = channel_compactor_reference(params, x)
    denom = jnp.maximum(jnp.abs(ref), 1.0)
    rel_err = float(jnp.max(jnp.abs(out - ref) / denom))
    assert rel_err < 5e-2, f"relative err too large: {rel_err}"

    print("KERNEL_OK")
</pallas_src>

<mosaic_0001>
module attributes {stable_mosaic.version = 11 : i64} {
  func.func @_cc_kernel(%arg0: i32, %arg1: i32, %arg2: memref<1x192x256xf32, #tpu.memory_space<vmem>>, %arg3: memref<32x192xbf16, #tpu.memory_space<vmem>>, %arg4: memref<32x1xf32, #tpu.memory_space<vmem>>, %arg5: memref<128x32xbf16, #tpu.memory_space<vmem>>, %arg6: memref<128x1xf32, #tpu.memory_space<vmem>>, %arg7: memref<1x128x256xf32, #tpu.memory_space<vmem>>) attributes {dimension_semantics = [#tpu.dimension_semantics<parallel>, #tpu.dimension_semantics<parallel>], iteration_bounds = array<i64: 2, 1>, scalar_prefetch = 0 : i64, scratch_operands = 0 : i64, tpu.core_type = #tpu.core_type<tc>, window_params = [{transform_indices = @transform_0, window_bounds = array<i64: 1, 192, 256>}, {pipeline_mode = #tpu.pipeline_mode<synchronous>, transform_indices = @transform_1, window_bounds = array<i64: 32, 192>}, {pipeline_mode = #tpu.pipeline_mode<synchronous>, transform_indices = @transform_2, window_bounds = array<i64: 32, 1>}, {pipeline_mode = #tpu.pipeline_mode<synchronous>, transform_indices = @transform_3, window_bounds = array<i64: 128, 32>}, {pipeline_mode = #tpu.pipeline_mode<synchronous>, transform_indices = @transform_4, window_bounds = array<i64: 128, 1>}, {transform_indices = @transform_5, window_bounds = array<i64: 1, 128, 256>}]} {
    %c0 = arith.constant 0 : index
    %c0_0 = arith.constant 0 : index
    %c0_1 = arith.constant 0 : index
    %0 = vector.load %arg2[%c0, %c0_0, %c0_1] : memref<1x192x256xf32, #tpu.memory_space<vmem>>, vector<1x192x256xf32>
    %1 = vector.shape_cast %0 : vector<1x192x256xf32> to vector<192x256xf32>
    %2 = arith.truncf %1 : vector<192x256xf32> to vector<192x256xbf16>
    %c0_2 = arith.constant 0 : index
    %c0_3 = arith.constant 0 : index
    %3 = vector.load %arg3[%c0_2, %c0_3] : memref<32x192xbf16, #tpu.memory_space<vmem>>, vector<32x192xbf16>
    %cst = arith.constant dense<0.000000e+00> : vector<32x256xf32>
    %4 = tpu.matmul %3, %2, %cst {dimension_numbers = #tpu.dot_dimension_numbers<[1], [0], [0], [1], [0, 0, 1, 1], [], []>} : vector<32x192xbf16>, vector<192x256xbf16>, vector<32x256xf32> -> vector<32x256xf32>
    %c0_4 = arith.constant 0 : index
    %c0_5 = arith.constant 0 : index
    %5 = vector.load %arg4[%c0_4, %c0_5] : memref<32x1xf32, #tpu.memory_space<vmem>>, vector<32x1xf32>
    %6 = vector.broadcast %5 : vector<32x1xf32> to vector<32x256xf32>
    %7 = arith.addf %4, %6 : vector<32x256xf32>
    %cst_6 = arith.constant 0.000000e+00 : f32
    %8 = vector.broadcast %cst_6 : f32 to vector<32x256xf32>
    %9 = arith.maximumf %7, %8 : vector<32x256xf32>
    %c0_7 = arith.constant 0 : index
    %c0_8 = arith.constant 0 : index
    %10 = vector.load %arg5[%c0_7, %c0_8] : memref<128x32xbf16, #tpu.memory_space<vmem>>, vector<128x32xbf16>
    %11 = arith.truncf %9 : vector<32x256xf32> to vector<32x256xbf16>
    %cst_9 = arith.constant dense<0.000000e+00> : vector<128x256xf32>
    %12 = tpu.matmul %10, %11, %cst_9 {dimension_numbers = #tpu.dot_dimension_numbers<[1], [0], [0], [1], [0, 0, 1, 1], [], []>} : vector<128x32xbf16>, vector<32x256xbf16>, vector<128x256xf32> -> vector<128x256xf32>
    %c0_10 = arith.constant 0 : index
    %c0_11 = arith.constant 0 : index
    %13 = vector.load %arg6[%c0_10, %c0_11] : memref<128x1xf32, #tpu.memory_space<vmem>>, vector<128x1xf32>
    %14 = vector.broadcast %13 : vector<128x1xf32> to vector<128x256xf32>
    %15 = arith.addf %12, %14 : vector<128x256xf32>
    %c0_12 = arith.constant 0 : index
    %c0_13 = arith.constant 0 : index
    %c0_14 = arith.constant 0 : index
    %16 = vector.load %arg7[%c0_12, %c0_13, %c0_14] : memref<1x128x256xf32, #tpu.memory_space<vmem>>, vector<1x128x256xf32>
    %17 = vector.shape_cast %16 : vector<1x128x256xf32> to vector<128x256xf32>
    %18 = vector.shape_cast %15 : vector<128x256xf32> to vector<1x128x256xf32>
    tpu.vector_store %arg7[%c0_12, %c0_13, %c0_14], %18 {strides = array<i32>} : memref<1x128x256xf32, #tpu.memory_space<vmem>>, vector<1x128x256xf32>,
    return
  }
  func.func @transform_0(%arg0: i32, %arg1: i32) -> (i32, i32, i32) {
    %c0_i32 = arith.constant 0 : i32
    %c0_i32_0 = arith.constant 0 : i32
    return %arg0, %c0_i32, %arg1 : i32, i32, i32
  }
  func.func @transform_1(%arg0: i32, %arg1: i32) -> (i32, i32) {
    %c0_i32 = arith.constant 0 : i32
    %c0_i32_0 = arith.constant 0 : i32
    %c0_i32_1 = arith.constant 0 : i32
    return %c0_i32, %c0_i32_0 : i32, i32
  }
  func.func @transform_2(%arg0: i32, %arg1: i32) -> (i32, i32) {
    %c0_i32 = arith.constant 0 : i32
    %c0_i32_0 = arith.constant 0 : i32
    %c0_i32_1 = arith.constant 0 : i32
    return %c0_i32, %c0_i32_0 : i32, i32
  }
  func.func @transform_3(%arg0: i32, %arg1: i32) -> (i32, i32) {
    %c0_i32 = arith.constant 0 : i32
    %c0_i32_0 = arith.constant 0 : i32
    %c0_i32_1 = arith.constant 0 : i32
    return %c0_i32, %c0_i32_0 : i32, i32
  }
  func.func @transform_4(%arg0: i32, %arg1: i32) -> (i32, i32) {
    %c0_i32 = arith.constant 0 : i32
    %c0_i32_0 = arith.constant 0 : i32
    %c0_i32_1 = arith.constant 0 : i32
    return %c0_i32, %c0_i32_0 : i32, i32
  }
  func.func @transform_5(%arg0: i32, %arg1: i32) -> (i32, i32, i32) {
    %c0_i32 = arith.constant 0 : i32
    %c0_i32_0 = arith.constant 0 : i32
    return %arg0, %c0_i32, %arg1 : i32, i32, i32
  }
}

</mosaic_0001>

<bundles_post_ra>
// kernel: channel_compactor_forward.1
= control target key start
LH: loop header
LB: loop body
LE: loop exit
PB: predicated region body
PF: predicated region fallthrough
CT: control target
= control target key end

     0   :  { %s1051_s18 = smov 0   ;;  %s1053_s19 = smov 0   ;;  %s1308_s0 = inlined_call_operand.vmem [shape: f32[2,192,256], index: 0, kind: input, shape index: {}]   ;;  %s1309_s1 = inlined_call_operand.vmem [shape: bf16[32,192], index: 1, kind: input, shape index: {}]   ;;  %s1310_s2 = inlined_call_operand.vmem [shape: f32[32,1], index: 2, kind: input, shape index: {}]   ;;  %s1311_s3 = inlined_call_operand.vmem [shape: bf16[128,32], index: 3, kind: input, shape index: {}]   ;;  %s1312_s4 = inlined_call_operand.vmem [shape: f32[128,1], index: 4, kind: input, shape index: {}]   ;;  %s1313_s5 = inlined_call_operand.vmem [shape: f32[2,128,256], index: 5, kind: output, shape index: {}]  }
   0x1   :  { %s1055_s20 = smov 0  }
   0x2 LB: > { %s27_s21 = sadd.s32 1, %s1014_s19  ;;  %p876_p0 = scmp.ge.s32.totalorder %s1018_s20, 1  ;;  %s1018_s20 = sphi %s1055_s20, %s15_s20   ;;  %s1014_s19 = sphi %s1053_s19, %s1315_s19   ;;  %s1010_s18 = sphi %s1051_s18, %s1314_s18  }
   0x3   : > { %p29_p1 = scmp.ge.s32.totalorder %s27_s21, 2  ;;  %p208_p2 = scmp.lt.s32.totalorder %s1018_s20, 3 }
   0x5   : > { %s1317_s21 = smov (%p29_p1, %s27_s21), 0  ;;  %p209_p3 = pnand %p876_p0, %p208_p2 }
   0x6   : > { %p245_p4 = scmp.lt.s32.totalorder (!%p209_p3), %s1010_s18, 1 }
   0x7   : > { %212 = sbr.rel (%p209_p3) target bundleno = 429 (0x1ad), region = 40 }
   0xc   : > { %v343_v0 = vld [vmem:[%s1310_s2 + $0x10] sm:$0xff]  ;;  %v341_v1 = vld [vmem:[%s1310_s2] sm:$0xff]  ;;  %v1020_v2 = vmov 0   ;;  %s1319_s18 = smov (!%p245_p4, %s1010_s18), 1  ;;  %v344_v3 = vld [vmem:[%s1310_s2 + $0x18] sm:$0xff]  ;;  %vm383_vm0 = vcmask 523264  }
   0xd   : > { %993 = vset.pattern.permute.xlu0 %v1020_v2  ;;  %994 = vset.pattern.permute.xlu1 %v1020_v2  ;;  %s967_s26 = smul.u32 384, %s1319_s18  ;;  %v342_v4 = vld [vmem:[%s1310_s2 + $0x8] sm:$0xff]  ;;  %v951_v55 = vld [vmem:[%s1309_s1 + $0x4] sm:$0xf]  ;;  %v496_v61 = vld [vmem:[%s1312_s4 + $0x10] sm:$0xff]  ;;  %vm630_vm1 = vcmask 261120  }
   0xe   : > { %357 = vperm.xlu0 %993, %v343_v0   ;;  %347 = vperm.xlu1 %994, %v341_v1   ;;  %v884_v56 = vld [vmem:[%s1309_s1 + $0x8] sm:$0xf0]  ;;  %s950_s10 = sshll.u32 %s1319_s18, 8 }
   0xf   : > { %995 = vset.pattern.permute.xlu2 %v1020_v2  ;;  %s1081_s29 = scalar_lea.vmem %s1308_s0, %s967_s26  ;;  %v887_v1 = vor.u32 %v951_v55, %v884_v56  ;;  %v497_v2 = vld [vmem:[%s1312_s4 + $0x18] sm:$0xff]  ;;  %s1259_s13 = scalar_lea.vmem %s1313_s5, %s950_s10 }
  0x10   : > { %v293_v5 = vld [vmem:[%s1081_s29 + $0xe0] sm:$0xff]  ;;  %v295_v6 = vld [vmem:[%s1081_s29 + $0xf0] sm:$0xff]  ;;  %v294_v7 = vld [vmem:[%s1081_s29 + $0xe8] sm:$0xff] }
  0x11   : > { %v327_v8 = vpack.c.bf16 %v295_v6, %v293_v5  ;;  %v296_v9 = vld [vmem:[%s1081_s29 + $0xf8] sm:$0xff]  ;;  %v289_v10 = vld [vmem:[%s1081_s29 + $0xc0] sm:$0xff]  ;;  %v291_v11 = vld [vmem:[%s1081_s29 + $0xd0] sm:$0xff] }
  0x12   : > { %v328_v12 = vpack.c.bf16 %v296_v9, %v294_v7  ;;  %v290_v13 = vld [vmem:[%s1081_s29 + $0xc8] sm:$0xff]  ;;  %v292_v14 = vld [vmem:[%s1081_s29 + $0xd8] sm:$0xff]  ;;  %v325_v15 = vpack.c.bf16 %v291_v11, %v289_v10  ;;  %v285_v16 = vld [vmem:[%s1081_s29 + $0xa0] sm:$0xff] }
  0x13   : > { %390 = vmatpush.bf16.msra.mxu0 %v327_v8  ;;  %v326_v17 = vpack.c.bf16 %v292_v14, %v290_v13  ;;  %v287_v18 = vld [vmem:[%s1081_s29 + $0xb0] sm:$0xff]  ;;  %v310_v19 = vld [vmem:[%s1081_s29 + $0x168] sm:$0xff]  ;;  %v312_v20 = vld [vmem:[%s1081_s29 + $0x178] sm:$0xff] }
  0x14   : > { %428 = vmatpush.bf16.msra.mxu2 %v328_v12  ;;  %v286_v21 = vld [vmem:[%s1081_s29 + $0xa8] sm:$0xff]  ;;  %v288_v22 = vld [vmem:[%s1081_s29 + $0xb8] sm:$0xff]  ;;  %v336_v23 = vpack.c.bf16 %v312_v20, %v310_v19  ;;  %v323_v26 = vpack.c.bf16 %v287_v18, %v285_v16  ;;  %v281_v27 = vld [vmem:[%s1081_s29 + $0x80] sm:$0xff] }
  0x15   : > { %v306_v24 = vld [vmem:[%s1081_s29 + $0x148] sm:$0xff]  ;;  %v308_v25 = vld [vmem:[%s1081_s29 + $0x158] sm:$0xff]  ;;  %v283_v28 = vld [vmem:[%s1081_s29 + $0x90] sm:$0xff]  ;;  %v324_v30 = vpack.c.bf16 %v288_v22, %v286_v21 }
  0x16   : > { %362 = vperm.xlu0 %993, %v344_v3   ;;  %352 = vperm.xlu1 %994, %v342_v4   ;;  %v334_v29 = vpack.c.bf16 %v308_v25, %v306_v24  ;;  %v309_v31 = vld [vmem:[%s1081_s29 + $0x160] sm:$0xff]  ;;  %v311_v32 = vld [vmem:[%s1081_s29 + $0x170] sm:$0xff]  ;;  %v302_v33 = vld [vmem:[%s1081_s29 + $0x128] sm:$0xff]  ;;  %v321_v39 = vpack.c.bf16 %v283_v28, %v281_v27 }
  0x17   : > { %391 = vmatpush.bf16.msra.mxu0 %v325_v15  ;;  %451 = vmatpush.bf16.msra.mxu3 %v336_v23  ;;  %v282_v34 = vld [vmem:[%s1081_s29 + $0x88] sm:$0xff]  ;;  %v284_v35 = vld [vmem:[%s1081_s29 + $0x98] sm:$0xff]  ;;  %v335_v36 = vpack.c.bf16 %v311_v32, %v309_v31  ;;  %v305_v38 = vld [vmem:[%s1081_s29 + $0x140] sm:$0xff] }
  0x18   : > { %429 = vmatpush.bf16.msra.mxu2 %v326_v17  ;;  %v304_v37 = vld [vmem:[%s1081_s29 + $0x138] sm:$0xff]  ;;  %v277_v40 = vld [vmem:[%s1081_s29 + $0x60] sm:$0xff]  ;;  %v279_v41 = vld [vmem:[%s1081_s29 + $0x70] sm:$0xff]  ;;  %v322_v44 = vpack.c.bf16 %v284_v35, %v282_v34 }
  0x19   : > { %v332_v42 = vpack.c.bf16 %v304_v37, %v302_v33  ;;  %v307_v43 = vld [vmem:[%s1081_s29 + $0x150] sm:$0xff]  ;;  %v278_v45 = vld [vmem:[%s1081_s29 + $0x68] sm:$0xff]  ;;  %413 = vmatpush.bf16.msra.mxu1 %v335_v36  ;;  %v300_v48 = vld [vmem:[%s1081_s29 + $0x118] sm:$0xff]  ;;  %v319_v52 = vpack.c.bf16 %v279_v41, %v277_v40 }
  0x1a   : > { %v333_v46 = vpack.c.bf16 %v307_v43, %v305_v38  ;;  %v298_v47 = vld [vmem:[%s1081_s29 + $0x108] sm:$0xff]  ;;  %v280_v49 = vld [vmem:[%s1081_s29 + $0x78] sm:$0xff]  ;;  %v301_v50 = vld [vmem:[%s1081_s29 + $0x120] sm:$0xff] }
  0x1b   : > { %392 = vmatpush.bf16.msra.mxu0 %v323_v26  ;;  %452 = vmatpush.bf16.msra.mxu3 %v334_v29  ;;  %v303_v51 = vld [vmem:[%s1081_s29 + $0x130] sm:$0xff]  ;;  %v273_v53 = vld [vmem:[%s1081_s29 + $0x40] sm:$0xff]  ;;  %v330_v54 = vpack.c.bf16 %v300_v48, %v298_v47  ;;  %v320_v57 = vpack.c.bf16 %v280_v49, %v278_v45  ;;  %v274_v59 = vld [vmem:[%s1081_s29 + $0x48] sm:$0xff] }
  0x1c   : > { %430 = vmatpush.bf16.msra.mxu2 %v324_v30  ;;  %v275_v58 = vld [vmem:[%s1081_s29 + $0x50] sm:$0xff]  ;;  %v331_v60 = vpack.c.bf16 %v303_v51, %v301_v50  ;;  %v276_v62 = vld [vmem:[%s1081_s29 + $0x58] sm:$0xff]  ;;  %v297_v63 = vld [vmem:[%s1081_s29 + $0x100] sm:$0xff] }
  0x1d   : > { %414 = vmatpush.bf16.msra.mxu1 %v333_v46  ;;  %v299_v0 = vld [vmem:[%s1081_s29 + $0x110] sm:$0xff]  ;;  %v317_v3 = vpack.c.bf16 %v275_v58, %v273_v53  ;;  %v318_v4 = vpack.c.bf16 %v276_v62, %v274_v59  ;;  %v269_v5 = vld [vmem:[%s1081_s29 + $0x20] sm:$0xff]  ;;  %v270_v8 = vld [vmem:[%s1081_s29 + $0x28] sm:$0xff] }
  0x1e   : > { %522 = vperm.xlu0 %993, %v496_v61   ;;  %v271_v6 = vld [vmem:[%s1081_s29 + $0x30] sm:$0xff]  ;;  %v329_v7 = vpack.c.bf16 %v299_v0, %v297_v63  ;;  %v272_v9 = vld [vmem:[%s1081_s29 + $0x38] sm:$0xff]  ;;  %527 = vperm.xlu1 %994, %v497_v2   ;;  %v499_v10 = vld [vmem:[%s1312_s4 + $0x28] sm:$0xff] }
  0x1f   : > { %393 = vmatpush.bf16.msra.mxu0 %v321_v39  ;;  %453 = vmatpush.bf16.msra.mxu3 %v332_v42  ;;  %v315_v11 = vpack.c.bf16 %v271_v6, %v269_v5  ;;  %v316_v12 = vpack.c.bf16 %v272_v9, %v270_v8  ;;  %v265_v13 = vld [vmem:[%s1081_s29] sm:$0xff]  ;;  %v267_v14 = vld [vmem:[%s1081_s29 + $0x10] sm:$0xff]  ;;  %v266_v15 = vld [vmem:[%s1081_s29 + $0x8] sm:$0xff] }
  0x20   : > { %431 = vmatpush.bf16.msra.mxu2 %v322_v44  ;;  %v268_v16 = vld [vmem:[%s1081_s29 + $0x18] sm:$0xff]  ;;  %v500_v17 = vld [vmem:[%s1312_s4 + $0x30] sm:$0xff]  ;;  %v313_v18 = vpack.c.bf16 %v267_v14, %v265_v13  ;;  %v882_v19 = vld [vmem:[%s1309_s1] sm:$0xf] }
  0x21   : > { %415 = vmatpush.bf16.msra.mxu1 %v331_v60  ;;  %v952_v20 = vld [vmem:[%s1309_s1 + $0x4] sm:$0xf0]  ;;  %v314_v21 = vpack.c.bf16 %v268_v16, %v266_v15  ;;  %v502_v23 = vld [vmem:[%s1312_s4 + $0x40] sm:$0xff]  ;;  %v953_v24 = vld [vmem:[%s1309_s1 + $0x14] sm:$0xf] }
  0x22   : > { %v883_v22 = vor.u32 %v952_v20, %v882_v19  ;;  %v892_v25 = vld [vmem:[%s1309_s1 + $0x18] sm:$0xf0]  ;;  %v503_v27 = vld [vmem:[%s1312_s4 + $0x48] sm:$0xff]  ;;  %v506_v29 = vld [vmem:[%s1312_s4 + $0x60] sm:$0xff] }
  0x23   : > { %394 = vmatpush.bf16.msra.mxu0 %v319_v52  ;;  %454 = vmatpush.bf16.msra.mxu3 %v330_v54  ;;  %v895_v26 = vor.u32 %v953_v24, %v892_v25  ;;  %v505_v28 = vld [vmem:[%s1312_s4 + $0x58] sm:$0xff]  ;;  %v890_v30 = vld [vmem:[%s1309_s1 + $0x10] sm:$0xf]  ;;  %v494_v5 = vld [vmem:[%s1312_s4] sm:$0xff] }
  0x24   : > { %432 = vmatpush.bf16.msra.mxu2 %v320_v57  ;;  %v954_v31 = vld [vmem:[%s1309_s1 + $0x14] sm:$0xf0]  ;;  %v508_v33 = vld [vmem:[%s1312_s4 + $0x70] sm:$0xff]  ;;  %512 = vperm.xlu2 %995, %v494_v5   ;;  %v955_v16 = vld [vmem:[%s1311_s3] sm:$0xff] }
  0x25   : > { %416 = vmatpush.bf16.msra.mxu1 %v329_v7  ;;  %v891_v32 = vor.u32 %v954_v31, %v890_v30  ;;  %v509_v34 = vld [vmem:[%s1312_s4 + $0x78] sm:$0xff]  ;;  %v495_v20 = vld [vmem:[%s1312_s4 + $0x8] sm:$0xff]  ;;  %v959_v25 = vld [vmem:[%s1311_s3 + $0x20] sm:$0xff] }
  0x26   : > { %898 = vmatmul.msk.bf16.vlgmr.msra.gmra.mxu3 %vm383_vm0, %v887_v1  ;;  %537 = vperm.xlu0 %993, %v499_v10   ;;  %v956_v24 = vld [vmem:[%s1311_s3 + $0x8] sm:$0xff]  ;;  %v961_v30 = vld [vmem:[%s1311_s3 + $0x30] sm:$0xff] }
  0x27   : > { %395 = vmatpush.bf16.msra.mxu0 %v317_v3  ;;  %542 = vperm.xlu1 %994, %v500_v17   ;;  %v958_v17 = vld [vmem:[%s1311_s3 + $0x18] sm:$0xff]  ;;  %v507_v31 = vld [vmem:[%s1312_s4 + $0x68] sm:$0xff] }
  0x28   : > { %433 = vmatpush.bf16.msra.mxu2 %v318_v4  ;;  %896 = vmatmul.msk.bf16.vlgmr.msra.gmra.mxu1 %vm383_vm0, %v887_v1 }
  0x2b   : > { %396 = vmatpush.bf16.msra.mxu0 %v315_v11 }
  0x2c   : > { %434 = vmatpush.bf16.msra.mxu2 %v316_v12  ;;  %517 = vperm.xlu2 %995, %v495_v20  }
  0x2e   : > { %552 = vperm.xlu0 %993, %v502_v23   ;;  %v498_v23 = vld [vmem:[%s1312_s4 + $0x20] sm:$0xff] }
  0x2f   : > { %397 = vmatpush.bf16.msra.mxu0 %v313_v18  ;;  %557 = vperm.xlu1 %994, %v503_v27   ;;  %v957_v27 = vld [vmem:[%s1311_s3 + $0x10] sm:$0xff] }
  0x30   : > { %435 = vmatpush.bf16.msra.mxu2 %v314_v21 }
  0x32   : > { %398 = vmatmul.bf16.vlgmr.msra.gmra.mxu0 %v883_v22 }
  0x33   : > { %436 = vmatmul.bf16.vlgmr.msra.gmra.mxu2 %v883_v22 }
  0x34   : > { %532 = vperm.xlu2 %995, %v498_v23  }
  0x36   : > { %899 = vmatmul.msk.bf16.gmra.mxu3 %vm383_vm0, %v895_v26  ;;  %567 = vperm.xlu0 %993, %v505_v28   ;;  %v960_v28 = vld [vmem:[%s1311_s3 + $0x28] sm:$0xff] }
  0x37   : > { %572 = vperm.xlu1 %994, %v506_v29   ;;  %v504_v29 = vld [vmem:[%s1312_s4 + $0x50] sm:$0xff] }
  0x38   : > { %897 = vmatmul.msk.bf16.gmra.mxu1 %vm383_vm0, %v895_v26  ;;  %v501_v26 = vld [vmem:[%s1312_s4 + $0x38] sm:$0xff] }
  0x3c   : > { %547 = vperm.xlu2 %995, %v501_v26  }
  0x3e   : > { %582 = vperm.xlu0 %993, %v508_v33  }
  0x3f   : > { %587 = vperm.xlu1 %994, %v509_v34  }
  0x42   : > { %403 = vmatmul.bf16.gmra.mxu0 %v891_v32 }
  0x43   : > { %441 = vmatmul.bf16.gmra.mxu2 %v891_v32  ;;  %v962_v32 = vld [vmem:[%s1311_s3 + $0x38] sm:$0xff] }
  0x44   : > { %562 = vperm.xlu2 %995, %v504_v29  }
  0x4c   : > { %577 = vperm.xlu2 %995, %v507_v31  }
  0x7e   : > { %v513_v33 = vpop.permute.xlu2 %512 }
  0x80   : > { %v358_v41 = vpop.permute.xlu0 %357  ;;  %v348_v42 = vpop.permute.xlu1 %347 }
  0x86   : > { %v518_v34 = vpop.permute.xlu2 %517 }
  0x88   : > { %v363_v48 = vpop.permute.xlu0 %362  ;;  %v353_v49 = vpop.permute.xlu1 %352 }
  0xa5   : > { %v418_v35 = vpop.f32.mrf.mxu1 }
  0xa9   : > { %v456_v37 = vpop.f32.mrf.mxu3 }
  0xad   : > { %v420_v38 = vpop.f32.mrf.mxu1 }
  0xaf   : > { %v399_v36 = vpop.f32.mrf.mxu0 }
  0xb0   : > { %v400_v50 = vadd.f32 %v399_v36, %v348_v42  ;;  %v523_v36 = vpop.permute.xlu0 %522 }
  0xb1   : > { %v458_v43 = vpop.f32.mrf.mxu3 }
  0xb2   : > { %v419_v58 = vadd.f32 %v418_v35, %v400_v50  ;;  %v528_v35 = vpop.permute.xlu1 %527 }
  0xb4   : > { %v466_v1 = vmax.f32 %v419_v58, 0.0 }
  0xb5   : > { %v423_v44 = vpop.f32.mrf.mxu1 }
  0xb6   : > { %v437_v39 = vpop.f32.mrf.mxu2 }
  0xb7   : > { %v401_v40 = vpop.f32.mrf.mxu0  ;;  %v438_v6 = vadd.f32 %v437_v39, %v348_v42 }
  0xb8   : > { %v402_v51 = vadd.f32 %v401_v40, %v353_v49 }
  0xb9   : > { %v461_v52 = vpop.f32.mrf.mxu3  ;;  %v457_v13 = vadd.f32 %v456_v37, %v438_v6  ;;  %v1253_v37 = vpop.permute.xlu2 %532 }
  0xba   : > { %v421_v59 = vadd.f32 %v420_v38, %v402_v51  ;;  %v543_v38 = vpop.permute.xlu1 %542 }
  0xbb   : > { %v467_v21 = vmax.f32 %v457_v13, 0.0 }
  0xbc   : > { %v468_v2 = vmax.f32 %v421_v59, 0.0 }
  0xbd   : > { %v425_v55 = vpop.f32.mrf.mxu1 }
  0xbe   : > { %v439_v45 = vpop.f32.mrf.mxu2  ;;  %v490_v12 = vpack.c.bf16 %v468_v2, %v466_v1 }
  0xbf   : > { %v404_v46 = vpop.f32.mrf.mxu0  ;;  %v440_v0 = vadd.f32 %v439_v45, %v353_v49 }
  0xc0   : > { %v405_v47 = vadd.f32 %v404_v46, %v358_v41 }
  0xc1   : > { %v463_v9 = vpop.f32.mrf.mxu3  ;;  %v459_v10 = vadd.f32 %v458_v43, %v440_v0  ;;  %v1263_v43 = vpop.permute.xlu0 %537 }
  0xc2   : > { %v424_v56 = vadd.f32 %v423_v44, %v405_v47  ;;  %v548_v44 = vpop.permute.xlu2 %547 }
  0xc3   : > { %v469_v18 = vmax.f32 %v459_v10, 0.0 }
  0xc4   : > { %v470_v62 = vmax.f32 %v424_v56, 0.0 }
  0xc5   : > { %v491_v22 = vpack.c.bf16 %v469_v18, %v467_v21 }
  0xc6   : > { %v442_v53 = vpop.f32.mrf.mxu2 }
  0xc7   : > { %v406_v54 = vpop.f32.mrf.mxu0  ;;  %v443_v61 = vadd.f32 %v442_v53, %v358_v41 }
  0xc8   : > { %v407_v57 = vadd.f32 %v406_v54, %v363_v48 }
  0xc9   : > { %v462_v7 = vadd.f32 %v461_v52, %v443_v61  ;;  %v553_v53 = vpop.permute.xlu0 %552 }
  0xca   : > { %v426_v60 = vadd.f32 %v425_v55, %v407_v57 }
  0xcb   : > { %v471_v14 = vmax.f32 %v462_v7, 0.0  ;;  %v563_v7 = vpop.permute.xlu2 %562 }
  0xcc   : > { %v472_v63 = vmax.f32 %v426_v60, 0.0 }
  0xce   : > { %v444_v3 = vpop.f32.mrf.mxu2  ;;  %v492_v4 = vpack.c.bf16 %v472_v63, %v470_v62  ;;  %v558_v62 = vpop.permute.xlu1 %557 }
  0xcf   : > { %v445_v8 = vadd.f32 %v444_v3, %v363_v48 }
  0xd0   : > { %661 = vmatpush.bf16.msrb.mxu0 %v492_v4  ;;  %963 = vmatpush.bf16.msrb.mxu1 %v492_v4 }
  0xd1   : > { %v464_v11 = vadd.f32 %v463_v9, %v445_v8 }
  0xd3   : > { %v473_v15 = vmax.f32 %v464_v11, 0.0 }
  0xd4   : > { %662 = vmatpush.bf16.msrb.mxu0 %v490_v12  ;;  %964 = vmatpush.bf16.msrb.mxu1 %v490_v12 }
  0xd5   : > { %v493_v19 = vpack.c.bf16 %v473_v15, %v471_v14 }
  0xd7   : > { %710 = vmatpush.bf16.msrb.mxu2 %v493_v19  ;;  %965 = vmatpush.bf16.msrb.mxu3 %v493_v19 }
  0xd8   : > { %932 = vmatmul.msk.bf16.vlgmr.msrb.gmra.mxu0 %vm630_vm1, %v955_v16  ;;  %935 = vmatmul.msk.bf16.vlgmr.msrb.gmra.mxu1 %vm630_vm1, %v958_v17 }
  0xdb   : > { %711 = vmatpush.bf16.msrb.mxu2 %v491_v22  ;;  %966 = vmatpush.bf16.msrb.mxu3 %v491_v22 }
  0xde   : > { %940 = vmatmul.msk.bf16.vlgmr.msrb.gmra.mxu2 %vm630_vm1, %v955_v16  ;;  %943 = vmatmul.msk.bf16.vlgmr.msrb.gmra.mxu3 %vm630_vm1, %v958_v17  ;;  %v568_v16 = vpop.permute.xlu0 %567 }
  0xe8   : > { %933 = vmatmul.msk.bf16.gmra.mxu0 %vm630_vm1, %v956_v24  ;;  %936 = vmatmul.msk.bf16.gmra.mxu1 %vm630_vm1, %v959_v25 }
  0xee   : > { %941 = vmatmul.msk.bf16.gmra.mxu2 %vm630_vm1, %v956_v24  ;;  %944 = vmatmul.msk.bf16.gmra.mxu3 %vm630_vm1, %v959_v25  ;;  %v573_v25 = vpop.permute.xlu1 %572 }
  0xf8   : > { %934 = vmatmul.msk.bf16.gmra.mxu0 %vm630_vm1, %v957_v27  ;;  %937 = vmatmul.msk.bf16.gmra.mxu1 %vm630_vm1, %v960_v28 }
  0xfe   : > { %942 = vmatmul.msk.bf16.gmra.mxu2 %vm630_vm1, %v957_v27  ;;  %945 = vmatmul.msk.bf16.gmra.mxu3 %vm630_vm1, %v960_v28 }
 0x108   : > { %938 = vmatmul.msk.bf16.gmra.mxu1 %vm630_vm1, %v961_v30 }
 0x10e   : > { %946 = vmatmul.msk.bf16.gmra.mxu3 %vm630_vm1, %v961_v30 }
 0x118   : > { %939 = vmatmul.msk.bf16.gmra.mxu1 %vm630_vm1, %v962_v32 }
 0x11e   : > { %947 = vmatmul.msk.bf16.gmra.mxu3 %vm630_vm1, %v962_v32 }
 0x155   : > { %v664_v39 = vpop.f32.mrf.mxu0  ;;  %v679_v40 = vpop.f32.mrf.mxu1 }
 0x156   : > { %v680_v41 = vadd.f32 %v679_v40, %v543_v38  ;;  %v665_v42 = vadd.f32 %v664_v39, %v513_v33 }
 0x158   : > { %765 = vst [vmem:[%s1259_s13 + $0x60] sm:$0xff] %v680_v41 }
 0x159   : > { %753 = vst [vmem:[%s1259_s13] sm:$0xff] %v665_v42  ;;  %v588_v42 = vpop.permute.xlu1 %587 }
 0x15d   : > { %v666_v45 = vpop.f32.mrf.mxu0  ;;  %v681_v46 = vpop.f32.mrf.mxu1 }
 0x15e   : > { %v667_v47 = vadd.f32 %v666_v45, %v518_v34  ;;  %v682_v48 = vadd.f32 %v681_v46, %v548_v44 }
 0x160   : > { %755 = vst [vmem:[%s1259_s13 + $0x10] sm:$0xff] %v667_v47 }
 0x161   : > { %v713_v49 = vpop.f32.mrf.mxu2  ;;  %v728_v50 = vpop.f32.mrf.mxu3  ;;  %767 = vst [vmem:[%s1259_s13 + $0x70] sm:$0xff] %v682_v48 }
 0x162   : > { %v729_v51 = vadd.f32 %v728_v50, %v543_v38  ;;  %v714_v52 = vadd.f32 %v713_v49, %v513_v33  ;;  %v578_v33 = vpop.permute.xlu2 %577 }
 0x164   : > { %766 = vst [vmem:[%s1259_s13 + $0x68] sm:$0xff] %v729_v51 }
 0x165   : > { %754 = vst [vmem:[%s1259_s13 + $0x8] sm:$0xff] %v714_v52  ;;  %v669_v54 = vpop.f32.mrf.mxu0  ;;  %v684_v55 = vpop.f32.mrf.mxu1 }
 0x166   : > { %v670_v56 = vadd.f32 %v669_v54, %v523_v36  ;;  %v685_v57 = vadd.f32 %v684_v55, %v553_v53 }
 0x168   : > { %757 = vst [vmem:[%s1259_s13 + $0x20] sm:$0xff] %v670_v56 }
 0x169   : > { %769 = vst [vmem:[%s1259_s13 + $0x80] sm:$0xff] %v685_v57  ;;  %v715_v58 = vpop.f32.mrf.mxu2  ;;  %v730_v59 = vpop.f32.mrf.mxu3 }
 0x16a   : > { %v716_v60 = vadd.f32 %v715_v58, %v518_v34  ;;  %v731_v61 = vadd.f32 %v730_v59, %v548_v44 }
 0x16c   : > { %756 = vst [vmem:[%s1259_s13 + $0x18] sm:$0xff] %v716_v60 }
 0x16d   : > { %v671_v63 = vpop.f32.mrf.mxu0  ;;  %v686_v0 = vpop.f32.mrf.mxu1  ;;  %768 = vst [vmem:[%s1259_s13 + $0x78] sm:$0xff] %v731_v61 }
 0x16e   : > { %v672_v1 = vadd.f32 %v671_v63, %v528_v35  ;;  %v687_v2 = vadd.f32 %v686_v0, %v558_v62 }
 0x170   : > { %759 = vst [vmem:[%s1259_s13 + $0x30] sm:$0xff] %v672_v1 }
 0x171   : > { %771 = vst [vmem:[%s1259_s13 + $0x90] sm:$0xff] %v687_v2  ;;  %v718_v3 = vpop.f32.mrf.mxu2  ;;  %v733_v4 = vpop.f32.mrf.mxu3 }
 0x172   : > { %v719_v5 = vadd.f32 %v718_v3, %v523_v36  ;;  %v734_v6 = vadd.f32 %v733_v4, %v553_v53 }
 0x174   : > { %758 = vst [vmem:[%s1259_s13 + $0x28] sm:$0xff] %v719_v5 }
 0x175   : > { %770 = vst [vmem:[%s1259_s13 + $0x88] sm:$0xff] %v734_v6  ;;  %v674_v8 = vpop.f32.mrf.mxu0  ;;  %v689_v9 = vpop.f32.mrf.mxu1 }
 0x176   : > { %v675_v10 = vadd.f32 %v674_v8, %v1253_v37  ;;  %v690_v11 = vadd.f32 %v689_v9, %v563_v7 }
 0x178   : > { %761 = vst [vmem:[%s1259_s13 + $0x40] sm:$0xff] %v675_v10 }
 0x179   : > { %v720_v12 = vpop.f32.mrf.mxu2  ;;  %v735_v13 = vpop.f32.mrf.mxu3  ;;  %773 = vst [vmem:[%s1259_s13 + $0xa0] sm:$0xff] %v690_v11 }
 0x17a   : > { %v721_v14 = vadd.f32 %v720_v12, %v528_v35  ;;  %v736_v15 = vadd.f32 %v735_v13, %v558_v62 }
 0x17c   : > { %760 = vst [vmem:[%s1259_s13 + $0x38] sm:$0xff] %v721_v14 }
 0x17d   : > { %772 = vst [vmem:[%s1259_s13 + $0x98] sm:$0xff] %v736_v15  ;;  %v676_v17 = vpop.f32.mrf.mxu0  ;;  %v691_v18 = vpop.f32.mrf.mxu1 }
 0x17e   : > { %v677_v19 = vadd.f32 %v676_v17, %v1263_v43  ;;  %v692_v20 = vadd.f32 %v691_v18, %v568_v16 }
 0x180   : > { %763 = vst [vmem:[%s1259_s13 + $0x50] sm:$0xff] %v677_v19 }
 0x181   : > { %775 = vst [vmem:[%s1259_s13 + $0xb0] sm:$0xff] %v692_v20  ;;  %v723_v21 = vpop.f32.mrf.mxu2  ;;  %v738_v22 = vpop.f32.mrf.mxu3 }
 0x182   : > { %v724_v23 = vadd.f32 %v723_v21, %v1253_v37  ;;  %v739_v24 = vadd.f32 %v738_v22, %v563_v7  ;;  %v583_v37 = vpop.permute.xlu0 %582 }
 0x184   : > { %762 = vst [vmem:[%s1259_s13 + $0x48] sm:$0xff] %v724_v23 }
 0x185   : > { %v694_v26 = vpop.f32.mrf.mxu1  ;;  %774 = vst [vmem:[%s1259_s13 + $0xa8] sm:$0xff] %v739_v24 }
 0x186   : > { %v695_v27 = vadd.f32 %v694_v26, %v573_v25 }
 0x188   : > { %777 = vst [vmem:[%s1259_s13 + $0xc0] sm:$0xff] %v695_v27 }
 0x189   : > { %v725_v28 = vpop.f32.mrf.mxu2  ;;  %v740_v29 = vpop.f32.mrf.mxu3 }
 0x18a   : > { %v726_v30 = vadd.f32 %v725_v28, %v1263_v43  ;;  %v741_v31 = vadd.f32 %v740_v29, %v568_v16 }
 0x18c   : > { %764 = vst [vmem:[%s1259_s13 + $0x58] sm:$0xff] %v726_v30 }
 0x18d   : > { %776 = vst [vmem:[%s1259_s13 + $0xb8] sm:$0xff] %v741_v31  ;;  %v696_v32 = vpop.f32.mrf.mxu1 }
 0x18e   : > { %v697_v34 = vadd.f32 %v696_v32, %v578_v33 }
 0x190   : > { %779 = vst [vmem:[%s1259_s13 + $0xd0] sm:$0xff] %v697_v34 }
 0x191   : > { %v743_v35 = vpop.f32.mrf.mxu3 }
 0x192   : > { %v744_v36 = vadd.f32 %v743_v35, %v573_v25 }
 0x194   : > { %778 = vst [vmem:[%s1259_s13 + $0xc8] sm:$0xff] %v744_v36 }
 0x195   : > { %v699_v38 = vpop.f32.mrf.mxu1 }
 0x196   : > { %v700_v39 = vadd.f32 %v699_v38, %v583_v37 }
 0x198   : > { %781 = vst [vmem:[%s1259_s13 + $0xe0] sm:$0xff] %v700_v39 }
 0x199   : > { %v745_v40 = vpop.f32.mrf.mxu3 }
 0x19a   : > { %v746_v41 = vadd.f32 %v745_v40, %v578_v33 }
 0x19c   : > { %780 = vst [vmem:[%s1259_s13 + $0xd8] sm:$0xff] %v746_v41 }
 0x19d   : > { %v701_v43 = vpop.f32.mrf.mxu1 }
 0x19e   : > { %v702_v44 = vadd.f32 %v701_v43, %v588_v42 }
 0x1a0   : > { %783 = vst [vmem:[%s1259_s13 + $0xf0] sm:$0xff] %v702_v44 }
 0x1a1   : > { %v748_v45 = vpop.f32.mrf.mxu3 }
 0x1a2   : > { %v749_v46 = vadd.f32 %v748_v45, %v583_v37 }
 0x1a4   : > { %782 = vst [vmem:[%s1259_s13 + $0xe8] sm:$0xff] %v749_v46 }
 0x1a9   : > { %v750_v47 = vpop.f32.mrf.mxu3 }
 0x1aa   : > { %v751_v48 = vadd.f32 %v750_v47, %v588_v42 }
 0x1ac   : > { %784 = vst [vmem:[%s1259_s13 + $0xf8] sm:$0xff] %v751_v48 }
 0x1ad PF: > { %s15_s20 = sadd.s32 1, %s1018_s20   ;;  %s1314_s18 = smov %s1014_s19 }
 0x1ae   : > { %p12_p5 = scmp.ge.s32.totalorder %s15_s20, 4   ;;  %s1315_s19 = smov %s1317_s21 }
 0x1b0   :  { %14 = sbr.rel (!%p12_p5) target bundleno = 2 (0x2), region = 70 }

</bundles_post_ra>
